<compile_context>
chip_gen: v6e
topology: v6e:2x2x1
jax: 0.10.0
libtpu: 0.0.40
codegen_flags: <defaults>
</compile_context>

<pallas_src>
import math

import jax
import jax.numpy as jnp
from jax.experimental import pallas as pl
from jax.experimental.pallas import tpu as pltpu


LOG_STD_MAX = 2.0
LOG_STD_MIN = -20.0
_HALF_LOG_2PI = 0.5 * math.log(2.0 * math.pi)
_LOG2 = math.log(2.0)


def _round_up(x, m):
    return (x + m - 1) // m * m


# ---------------------------------------------------------------------------
# Kernel
# ---------------------------------------------------------------------------
def _make_actor_kernel(num_hidden, state_dim, action_dim, deterministic):
    """Fused Actor forward.

    Stochastic ref order:   state, w_hidden, b_hidden, w_head, b_head, eps, out
    Deterministic ref order: state, w_hidden, b_hidden, w_head, b_head, out
    out columns: [0:action_dim] = a, [action_dim] = logp, rest = 0.
    """

    def body(state_ref, wh_ref, bh_ref, whead_ref, bhead_ref, eps_ref, out_ref):
        # a_net: Linear + ReLU for every layer (h_acti and o_acti are both ReLU).
        # Hidden weights are zero-padded to [D, D]; padded columns stay exactly
        # 0 through ReLU, so padding is semantically transparent.
        h = state_ref[...]
        for j in range(num_hidden):
            w = wh_ref[j]                       # [D, D]
            if j == 0 and state_dim != w.shape[0]:
                # state is NOT padded in the wrapper; rows >= state_dim of the
                # zero-padded first weight would contribute nothing anyway.
                w = w[:state_dim, :]
            h = jnp.dot(h, w, preferred_element_type=jnp.float32) + bh_ref[j]
            h = jnp.maximum(h, 0.0)

        # Fused mu / log_std head: one matmul, static column split.
        head = (jnp.dot(h, whead_ref[...], preferred_element_type=jnp.float32)
                + bhead_ref[...])
        mu = head[:, 0:action_dim]
        log_std = jnp.clip(head[:, action_dim:2 * action_dim],
                           LOG_STD_MIN, LOG_STD_MAX)
        std = jnp.exp(log_std)

        # u = mu (deterministic) or reparameterized sample mu + std * eps.
        # Normal log_prob uses z = (u - mu)/std, which is exactly eps (or 0).
        if deterministic:
            u = mu
            log_prob_gauss = -log_std - _HALF_LOG_2PI
        else:
            eps = eps_ref[...]
            u = mu + std * eps
            log_prob_gauss = -0.5 * eps * eps - log_std - _HALF_LOG_2PI

        # tanh-Jacobian correction (applied to all columns, matching the
        # reference PyTorch code even for the relu6-squashed column 0).
        correction = 2.0 * (_LOG2 - u - jax.nn.softplus(-2.0 * u))
        logp = jnp.sum(log_prob_gauss - correction, axis=1, keepdims=True)

        # Squash: relu6 on column 0 when action_dim == 3, tanh elsewhere.
        if action_dim == 3:
            col = jax.lax.broadcasted_iota(jnp.int32, u.shape, 1)
            a = jnp.where(col == 0, jnp.clip(u, 0.0, 6.0), jnp.tanh(u))
        else:
            a = jnp.tanh(u)

        # Compose the full [TB, OUT_W] output slab in vregs (lane-id iota +
        # VPU selects) and issue a single unmasked full-tile store, instead of
        # a zero fill + several narrow masked slice stores.
        lane = jax.lax.broadcasted_iota(jnp.int32, out_ref.shape, 1)
        slab = jnp.where(lane == action_dim, logp, 0.0)
        for c in range(action_dim):
            slab = slab + jnp.where(lane == c, a[:, c:c + 1], 0.0)
        out_ref[...] = slab.astype(out_ref.dtype)

    if deterministic:
        def kernel(state_ref, wh_ref, bh_ref, whead_ref, bhead_ref, out_ref):
            body(state_ref, wh_ref, bh_ref, whead_ref, bhead_ref, None, out_ref)
        return kernel
    return body


# ---------------------------------------------------------------------------
# Parameter packing (do once, outside the per-step call path)
# ---------------------------------------------------------------------------
def pack_actor_params(params, state_dim):
    """Packs per-layer weights into stacked, zero-padded operands.

    params: dict with
      'hidden': list of (W [in,out], b [1,out]),
      'mu':     (W, b),
      'log_std':(W, b)
    """
    hidden = params["hidden"]
    num_hidden = len(hidden)
    widths = [state_dim] + [w.shape[1] for (w, _) in hidden]
    D = max(widths)

    wh = jnp.zeros((num_hidden, D, D), jnp.float32)
    bh = jnp.zeros((num_hidden, 1, D), jnp.float32)
    for j, (w, b) in enumerate(hidden):
        wh = wh.at[j, : w.shape[0], : w.shape[1]].set(w)
        bh = bh.at[j, :, : b.shape[1]].set(b)

    w_mu, b_mu = params["mu"]
    w_ls, b_ls = params["log_std"]
    action_dim = w_mu.shape[1]
    whead = jnp.zeros((D, 2 * action_dim), jnp.float32)
    whead = whead.at[: w_mu.shape[0], :action_dim].set(w_mu)
    whead = whead.at[: w_ls.shape[0], action_dim:].set(w_ls)
    bhead = jnp.concatenate([b_mu, b_ls], axis=1)

    return dict(wh=wh, bh=bh, whead=whead, bhead=bhead,
                D=D, num_hidden=num_hidden, action_dim=action_dim,
                state_dim=state_dim)


# ---------------------------------------------------------------------------
# Wrapper
# ---------------------------------------------------------------------------
def actor_forward(state, packed, eps=None, deterministic=False, block_rows=512):
    B, state_dim = state.shape
    assert state_dim == packed["state_dim"]
    D = packed["D"]
    act = packed["action_dim"]
    nh = packed["num_hidden"]

    has_eps = not deterministic
    if has_eps and eps is None:
        raise ValueError("eps is required on the stochastic path")

    OUT_W = max(8, act + 1)                      # lane-padded: a || logp || 0

    # Batch tiling: bounded tile, ceil-div grid.  Rows are independent, so a
    # partial tail block computes garbage rows that are never written back.
    # Large batches get a multi-block "parallel" grid -> input/output
    # pipelining on all generations and 2-TC sharding on v7x.
    TB = min(_round_up(B, 8), block_rows)
    grid = (pl.cdiv(B, TB),)

    kernel = _make_actor_kernel(nh, state_dim, act, deterministic)

    # VMEM budget derived from actual block sizes (double-buffered streaming
    # operands + resident weights) with headroom; clamped so it is portable
    # across v5e/v6e (128 MiB) and v7x (64 MiB physical VMEM).
    weight_bytes = 4 * (packed["wh"].size + packed["bh"].size
                        + packed["whead"].size + packed["bhead"].size)
    stream_bytes = 4 * TB * (state_dim + (act if has_eps else 0) + OUT_W)
    vmem_limit = min(max(2 * (weight_bytes + stream_bytes) + (1 << 20),
                         4 * 1024 * 1024),
                     32 * 1024 * 1024)

    flops = 2 * B * (nh * D * D + D * 2 * act) + 30 * B * act
    transcendentals = 5 * B * act                # exp, tanh, softplus(exp+log)
    bytes_accessed = 4 * (state.size + (eps.size if has_eps else 0)
                          + packed["wh"].size + packed["bh"].size
                          + packed["whead"].size + packed["bhead"].size
                          + B * OUT_W)

    in_specs = [
        pl.BlockSpec((TB, state_dim), lambda i: (i, 0)),      # state (unpadded)
        pl.BlockSpec((nh, D, D), lambda i: (0, 0, 0)),        # hidden W stack
        pl.BlockSpec((nh, 1, D), lambda i: (0, 0, 0)),        # hidden b stack
        pl.BlockSpec((D, 2 * act), lambda i: (0, 0)),         # fused head W
        pl.BlockSpec((1, 2 * act), lambda i: (0, 0)),         # fused head b
    ]
    args = [state, packed["wh"], packed["bh"], packed["whead"], packed["bhead"]]
    if has_eps:
        in_specs.append(pl.BlockSpec((TB, act), lambda i: (i, 0)))
        args.append(eps)

    out = pl.pallas_call(
        kernel,
        out_shape=jax.ShapeDtypeStruct((B, OUT_W), jnp.float32),
        grid=grid,
        in_specs=in_specs,
        out_specs=pl.BlockSpec((TB, OUT_W), lambda i: (i, 0)),
        compiler_params=pltpu.CompilerParams(
            dimension_semantics=("parallel",),
            vmem_limit_bytes=vmem_limit),
        cost_estimate=pl.CostEstimate(flops=flops,
                                      transcendentals=transcendentals,
                                      bytes_accessed=bytes_accessed),
    )(*args)

    a = out[:, :act]
    logp = out[:, act:act + 1]
    return a, logp


# ---------------------------------------------------------------------------
# Deterministic parameter init (matches nn.Linear default: U(-1/sqrt(fan_in), +))
# ---------------------------------------------------------------------------
def init_linear(key, fan_in, fan_out):
    kw, kb = jax.random.split(key)
    bound = 1.0 / math.sqrt(fan_in)
    w = jax.random.uniform(kw, (fan_in, fan_out), jnp.float32, -bound, bound)
    b = jax.random.uniform(kb, (1, fan_out), jnp.float32, -bound, bound)
    return w, b


def init_actor_params(key, state_dim, action_dim, hid_shape):
    layers = [state_dim] + list(hid_shape)
    keys = jax.random.split(key, len(layers) + 1)
    hidden = []
    for j in range(len(layers) - 1):
        hidden.append(init_linear(keys[j], layers[j], layers[j + 1]))
    mu = init_linear(keys[-2], layers[-1], action_dim)
    log_std = init_linear(keys[-1], layers[-1], action_dim)
    return {"hidden": hidden, "mu": mu, "log_std": log_std}


# ---------------------------------------------------------------------------
# Pure-JAX reference (for correctness check)
# ---------------------------------------------------------------------------
def actor_forward_ref(state, params, eps, action_dim, deterministic=False):
    h = state
    for (w, b) in params["hidden"]:
        h = jnp.maximum(h @ w + b, 0.0)
    mu = h @ params["mu"][0] + params["mu"][1]
    log_std = jnp.clip(h @ params["log_std"][0] + params["log_std"][1],
                       LOG_STD_MIN, LOG_STD_MAX)
    std = jnp.exp(log_std)
    u = mu if deterministic else mu + std * eps
    if action_dim == 3:
        a_t = jnp.clip(u[:, 0:1], 0.0, 6.0)
        a_m = jnp.tanh(u[:, 1:3])
        a = jnp.concatenate([a_t, a_m], axis=1)
    else:
        a = jnp.tanh(u)
    z = (u - mu) / std
    lp = (-0.5 * z * z - log_std - 0.5 * math.log(2 * math.pi))
    corr = 2.0 * (math.log(2.0) - u - jax.nn.softplus(-2.0 * u))
    logp = lp.sum(1, keepdims=True) - corr.sum(1, keepdims=True)
    return a, logp


if __name__ == "__main__":
    # Shapes consistent with the module: state_dim=16, hid_shape=(32, 32),
    # action_dim=3 (exercises the relu6/tanh branch), batch=8.
    B, STATE_DIM, ACTION_DIM = 8, 16, 3
    HID_SHAPE = (32, 32)

    root = jax.random.PRNGKey(0)
    k_params, k_state, k_eps = jax.random.split(root, 3)

    params = init_actor_params(k_params, STATE_DIM, ACTION_DIM, HID_SHAPE)
    packed = pack_actor_params(params, STATE_DIM)
    state = jax.random.normal(k_state, (B, STATE_DIM), jnp.float32)
    eps = jax.random.normal(k_eps, (B, ACTION_DIM), jnp.float32)

    # Stochastic path
    a, logp = actor_forward(state, packed, eps, deterministic=False)
    a = jax.block_until_ready(a)
    logp = jax.block_until_ready(logp)
    a_ref, logp_ref = actor_forward_ref(state, params, eps, ACTION_DIM, False)
    assert a.shape == (B, ACTION_DIM) and logp.shape == (B, 1)
    assert jnp.allclose(a, a_ref, atol=1e-5, rtol=1e-5)
    assert jnp.allclose(logp, logp_ref, atol=1e-4, rtol=1e-4)

    # Deterministic path (no eps operand is DMA'd)
    a_d, logp_d = actor_forward(state, packed, deterministic=True)
    a_d = jax.block_until_ready(a_d)
    a_dr, logp_dr = actor_forward_ref(state, params, eps, ACTION_DIM, True)
    assert jnp.allclose(a_d, a_dr, atol=1e-5, rtol=1e-5)
    assert jnp.allclose(logp_d, logp_dr, atol=1e-4, rtol=1e-4)

    # Generic action_dim (pure tanh squash) path
    params2 = init_actor_params(jax.random.PRNGKey(1), STATE_DIM, 2, HID_SHAPE)
    packed2 = pack_actor_params(params2, STATE_DIM)
    eps2 = jax.random.normal(jax.random.PRNGKey(2), (B, 2), jnp.float32)
    a2, logp2 = actor_forward(state, packed2, eps2, deterministic=False)
    a2 = jax.block_until_ready(a2)
    a2_ref, logp2_ref = actor_forward_ref(state, params2, eps2, 2, False)
    assert jnp.allclose(a2, a2_ref, atol=1e-5, rtol=1e-5)
    assert jnp.allclose(logp2, logp2_ref, atol=1e-4, rtol=1e-4)

    print("KERNEL_OK")
</pallas_src>

<mosaic_0001>
module attributes {stable_mosaic.version = 11 : i64} {
  func.func @body(%arg0: i32, %arg1: memref<8x16xf32, #tpu.memory_space<vmem>>, %arg2: memref<2x32x32xf32, #tpu.memory_space<vmem>>, %arg3: memref<2x1x32xf32, #tpu.memory_space<vmem>>, %arg4: memref<32x6xf32, #tpu.memory_space<vmem>>, %arg5: memref<1x6xf32, #tpu.memory_space<vmem>>, %arg6: memref<8x3xf32, #tpu.memory_space<vmem>>, %arg7: memref<8x8xf32, #tpu.memory_space<vmem>>) attributes {dimension_semantics = [#tpu.dimension_semantics<parallel>], iteration_bounds = array<i64: 1>, scalar_prefetch = 0 : i64, scratch_operands = 0 : i64, tpu.core_type = #tpu.core_type<tc>, window_params = [{transform_indices = @transform_0, window_bounds = array<i64: 8, 16>}, {pipeline_mode = #tpu.pipeline_mode<synchronous>, transform_indices = @transform_1, window_bounds = array<i64: 2, 32, 32>}, {pipeline_mode = #tpu.pipeline_mode<synchronous>, transform_indices = @transform_2, window_bounds = array<i64: 2, 1, 32>}, {pipeline_mode = #tpu.pipeline_mode<synchronous>, transform_indices = @transform_3, window_bounds = array<i64: 32, 6>}, {pipeline_mode = #tpu.pipeline_mode<synchronous>, transform_indices = @transform_4, window_bounds = array<i64: 1, 6>}, {transform_indices = @transform_5, window_bounds = array<i64: 8, 3>}, {transform_indices = @transform_6, window_bounds = array<i64: 8, 8>}]} {
    %c0 = arith.constant 0 : index
    %c0_0 = arith.constant 0 : index
    %0 = vector.load %arg1[%c0, %c0_0] : memref<8x16xf32, #tpu.memory_space<vmem>>, vector<8x16xf32>
    %c0_1 = arith.constant 0 : index
    %c0_2 = arith.constant 0 : index
    %c0_3 = arith.constant 0 : index
    %1 = vector.load %arg2[%c0_1, %c0_2, %c0_3] : memref<2x32x32xf32, #tpu.memory_space<vmem>>, vector<1x32x32xf32>
    %2 = vector.shape_cast %1 : vector<1x32x32xf32> to vector<32x32xf32>
    %3 = vector.extract_strided_slice %2 {offsets = [0, 0], sizes = [16, 32], strides = [1, 1]} : vector<32x32xf32> to vector<16x32xf32>
    %cst = arith.constant dense<0.000000e+00> : vector<8x32xf32>
    %4 = tpu.matmul %0, %3, %cst {dimension_numbers = #tpu.dot_dimension_numbers<[1], [0], [0], [1], [0, 0, 1, 1], [], []>} : vector<8x16xf32>, vector<16x32xf32>, vector<8x32xf32> -> vector<8x32xf32>
    %c0_4 = arith.constant 0 : index
    %c0_5 = arith.constant 0 : index
    %c0_6 = arith.constant 0 : index
    %5 = vector.load %arg3[%c0_4, %c0_5, %c0_6] : memref<2x1x32xf32, #tpu.memory_space<vmem>>, vector<1x1x32xf32>
    %6 = vector.shape_cast %5 : vector<1x1x32xf32> to vector<1x32xf32>
    %7 = vector.broadcast %6 : vector<1x32xf32> to vector<8x32xf32>
    %8 = arith.addf %4, %7 : vector<8x32xf32>
    %cst_7 = arith.constant 0.000000e+00 : f32
    %9 = vector.broadcast %cst_7 : f32 to vector<8x32xf32>
    %10 = arith.maximumf %8, %9 : vector<8x32xf32>
    %c1 = arith.constant 1 : index
    %c0_8 = arith.constant 0 : index
    %c0_9 = arith.constant 0 : index
    %11 = vector.load %arg2[%c1, %c0_8, %c0_9] : memref<2x32x32xf32, #tpu.memory_space<vmem>>, vector<1x32x32xf32>
    %12 = vector.shape_cast %11 : vector<1x32x32xf32> to vector<32x32xf32>
    %cst_10 = arith.constant dense<0.000000e+00> : vector<8x32xf32>
    %13 = tpu.matmul %10, %12, %cst_10 {dimension_numbers = #tpu.dot_dimension_numbers<[1], [0], [0], [1], [0, 0, 1, 1], [], []>} : vector<8x32xf32>, vector<32x32xf32>, vector<8x32xf32> -> vector<8x32xf32>
    %c1_11 = arith.constant 1 : index
    %c0_12 = arith.constant 0 : index
    %c0_13 = arith.constant 0 : index
    %14 = vector.load %arg3[%c1_11, %c0_12, %c0_13] : memref<2x1x32xf32, #tpu.memory_space<vmem>>, vector<1x1x32xf32>
    %15 = vector.shape_cast %14 : vector<1x1x32xf32> to vector<1x32xf32>
    %16 = vector.broadcast %15 : vector<1x32xf32> to vector<8x32xf32>
    %17 = arith.addf %13, %16 : vector<8x32xf32>
    %cst_14 = arith.constant 0.000000e+00 : f32
    %18 = vector.broadcast %cst_14 : f32 to vector<8x32xf32>
    %19 = arith.maximumf %17, %18 : vector<8x32xf32>
    %c0_15 = arith.constant 0 : index
    %c0_16 = arith.constant 0 : index
    %20 = vector.load %arg4[%c0_15, %c0_16] : memref<32x6xf32, #tpu.memory_space<vmem>>, vector<32x6xf32>
    %cst_17 = arith.constant dense<0.000000e+00> : vector<8x6xf32>
    %21 = tpu.matmul %19, %20, %cst_17 {dimension_numbers = #tpu.dot_dimension_numbers<[1], [0], [0], [1], [0, 0, 1, 1], [], []>} : vector<8x32xf32>, vector<32x6xf32>, vector<8x6xf32> -> vector<8x6xf32>
    %c0_18 = arith.constant 0 : index
    %c0_19 = arith.constant 0 : index
    %22 = vector.load %arg5[%c0_18, %c0_19] : memref<1x6xf32, #tpu.memory_space<vmem>>, vector<1x6xf32>
    %23 = vector.broadcast %22 : vector<1x6xf32> to vector<8x6xf32>
    %24 = arith.addf %21, %23 : vector<8x6xf32>
    %25 = vector.extract_strided_slice %24 {offsets = [0, 0], sizes = [8, 3], strides = [1, 1]} : vector<8x6xf32> to vector<8x3xf32>
    %26 = vector.extract_strided_slice %24 {offsets = [0, 3], sizes = [8, 3], strides = [1, 1]} : vector<8x6xf32> to vector<8x3xf32>
    %cst_20 = arith.constant -2.000000e+01 : f32
    %cst_21 = arith.constant 2.000000e+00 : f32
    %27 = vector.broadcast %cst_20 : f32 to vector<8x3xf32>
    %28 = arith.maximumf %27, %26 : vector<8x3xf32>
    %29 = vector.broadcast %cst_21 : f32 to vector<8x3xf32>
    %30 = arith.minimumf %29, %28 : vector<8x3xf32>
    %31 = math.exp %30 : vector<8x3xf32>
    %c0_22 = arith.constant 0 : index
    %c0_23 = arith.constant 0 : index
    %32 = vector.load %arg6[%c0_22, %c0_23] : memref<8x3xf32, #tpu.memory_space<vmem>>, vector<8x3xf32>
    %33 = arith.mulf %31, %32 : vector<8x3xf32>
    %34 = arith.addf %25, %33 : vector<8x3xf32>
    %cst_24 = arith.constant -5.000000e-01 : f32
    %35 = vector.broadcast %cst_24 : f32 to vector<8x3xf32>
    %36 = arith.mulf %35, %32 : vector<8x3xf32>
    %37 = arith.mulf %36, %32 : vector<8x3xf32>
    %38 = arith.subf %37, %30 : vector<8x3xf32>
    %cst_25 = arith.constant 0.918938517 : f32
    %39 = vector.broadcast %cst_25 : f32 to vector<8x3xf32>
    %40 = arith.subf %38, %39 : vector<8x3xf32>
    %cst_26 = arith.constant 0.693147182 : f32
    %41 = vector.broadcast %cst_26 : f32 to vector<8x3xf32>
    %42 = arith.subf %41, %34 : vector<8x3xf32>
    %cst_27 = arith.constant -2.000000e+00 : f32
    %43 = vector.broadcast %cst_27 : f32 to vector<8x3xf32>
    %44 = arith.mulf %43, %34 : vector<8x3xf32>
    %cst_28 = arith.constant 0.000000e+00 : f32
    %45 = vector.broadcast %cst_28 : f32 to vector<8x3xf32>
    %46 = arith.maximumf %44, %45 : vector<8x3xf32>
    %47 = vector.broadcast %cst_28 : f32 to vector<8x3xf32>
    %48 = arith.subf %44, %47 : vector<8x3xf32>
    %49 = arith.cmpf one, %48, %48 : vector<8x3xf32>
    %50 = vector.broadcast %cst_28 : f32 to vector<8x3xf32>
    %51 = arith.addf %44, %50 : vector<8x3xf32>
    %52 = math.absf %48 : vector<8x3xf32>
    %cst_29 = arith.constant 0.000000e+00 : f32
    %53 = vector.broadcast %cst_29 : f32 to vector<8x3xf32>
    %54 = arith.subf %53, %52 : vector<8x3xf32>
    %55 = math.exp %54 : vector<8x3xf32>
    %56 = math.log1p %55 : vector<8x3xf32>
    %57 = arith.addf %46, %56 : vector<8x3xf32>
    %58 = arith.select %49, %51, %57 : vector<8x3xi1>, vector<8x3xf32>
    %59 = arith.subf %42, %58 : vector<8x3xf32>
    %cst_30 = arith.constant 2.000000e+00 : f32
    %60 = vector.broadcast %cst_30 : f32 to vector<8x3xf32>
    %61 = arith.mulf %60, %59 : vector<8x3xf32>
    %62 = arith.subf %40, %61 : vector<8x3xf32>
    %cst_31 = arith.constant dense<0.000000e+00> : vector<8xf32>
    %63 = vector.multi_reduction <add>, %62, %cst_31 [1] : vector<8x3xf32> to vector<8xf32>
    %64 = vector.shape_cast %63 : vector<8xf32> to vector<8x1xf32>
    %65 = tpu.iota {dimensions = array<i32: 1>} : vector<8x3xi32>
    %c0_i32 = arith.constant 0 : i32
    %66 = vector.broadcast %c0_i32 : i32 to vector<8x3xi32>
    %67 = arith.cmpi eq, %65, %66 : vector<8x3xi32>
    %cst_32 = arith.constant 0.000000e+00 : f32
    %cst_33 = arith.constant 6.000000e+00 : f32
    %68 = vector.broadcast %cst_32 : f32 to vector<8x3xf32>
    %69 = arith.maximumf %68, %34 : vector<8x3xf32>
    %70 = vector.broadcast %cst_33 : f32 to vector<8x3xf32>
    %71 = arith.minimumf %70, %69 : vector<8x3xf32>
    %72 = math.tanh %34 : vector<8x3xf32>
    %73 = arith.select %67, %71, %72 : vector<8x3xi1>, vector<8x3xf32>
    %74 = tpu.iota {dimensions = array<i32: 1>} : vector<8x8xi32>
    %c3_i32 = arith.constant 3 : i32
    %75 = vector.broadcast %c3_i32 : i32 to vector<8x8xi32>
    %76 = arith.cmpi eq, %74, %75 : vector<8x8xi32>
    %cst_34 = arith.constant 0.000000e+00 : f32
    %77 = vector.shape_cast %64 : vector<8x1xf32> to vector<8x1xf32>
    %78 = vector.broadcast %77 : vector<8x1xf32> to vector<8x8xf32>
    %79 = vector.broadcast %cst_34 : f32 to vector<8x8xf32>
    %80 = arith.select %76, %78, %79 : vector<8x8xi1>, vector<8x8xf32>
    %c0_i32_35 = arith.constant 0 : i32
    %81 = vector.broadcast %c0_i32_35 : i32 to vector<8x8xi32>
    %82 = arith.cmpi eq, %74, %81 : vector<8x8xi32>
    %83 = vector.extract_strided_slice %73 {offsets = [0, 0], sizes = [8, 1], strides = [1, 1]} : vector<8x3xf32> to vector<8x1xf32>
    %cst_36 = arith.constant 0.000000e+00 : f32
    %84 = vector.shape_cast %83 : vector<8x1xf32> to vector<8x1xf32>
    %85 = vector.broadcast %84 : vector<8x1xf32> to vector<8x8xf32>
    %86 = vector.broadcast %cst_36 : f32 to vector<8x8xf32>
    %87 = arith.select %82, %85, %86 : vector<8x8xi1>, vector<8x8xf32>
    %88 = arith.addf %80, %87 : vector<8x8xf32>
    %c1_i32 = arith.constant 1 : i32
    %89 = vector.broadcast %c1_i32 : i32 to vector<8x8xi32>
    %90 = arith.cmpi eq, %74, %89 : vector<8x8xi32>
    %91 = vector.extract_strided_slice %73 {offsets = [0, 1], sizes = [8, 1], strides = [1, 1]} : vector<8x3xf32> to vector<8x1xf32>
    %cst_37 = arith.constant 0.000000e+00 : f32
    %92 = vector.shape_cast %91 : vector<8x1xf32> to vector<8x1xf32>
    %93 = vector.broadcast %92 : vector<8x1xf32> to vector<8x8xf32>
    %94 = vector.broadcast %cst_37 : f32 to vector<8x8xf32>
    %95 = arith.select %90, %93, %94 : vector<8x8xi1>, vector<8x8xf32>
    %96 = arith.addf %88, %95 : vector<8x8xf32>
    %c2_i32 = arith.constant 2 : i32
    %97 = vector.broadcast %c2_i32 : i32 to vector<8x8xi32>
    %98 = arith.cmpi eq, %74, %97 : vector<8x8xi32>
    %99 = vector.extract_strided_slice %73 {offsets = [0, 2], sizes = [8, 1], strides = [1, 1]} : vector<8x3xf32> to vector<8x1xf32>
    %cst_38 = arith.constant 0.000000e+00 : f32
    %100 = vector.shape_cast %99 : vector<8x1xf32> to vector<8x1xf32>
    %101 = vector.broadcast %100 : vector<8x1xf32> to vector<8x8xf32>
    %102 = vector.broadcast %cst_38 : f32 to vector<8x8xf32>
    %103 = arith.select %98, %101, %102 : vector<8x8xi1>, vector<8x8xf32>
    %104 = arith.addf %96, %103 : vector<8x8xf32>
    %c0_39 = arith.constant 0 : index
    %c0_40 = arith.constant 0 : index
    %105 = vector.load %arg7[%c0_39, %c0_40] : memref<8x8xf32, #tpu.memory_space<vmem>>, vector<8x8xf32>
    tpu.vector_store %arg7[%c0_39, %c0_40], %104 {strides = array<i32>} : memref<8x8xf32, #tpu.memory_space<vmem>>, vector<8x8xf32>,
    return
  }
  func.func @transform_0(%arg0: i32) -> (i32, i32) {
    %c0_i32 = arith.constant 0 : i32
    %c0_i32_0 = arith.constant 0 : i32
    return %arg0, %c0_i32 : i32, i32
  }
  func.func @transform_1(%arg0: i32) -> (i32, i32, i32) {
    %c0_i32 = arith.constant 0 : i32
    %c0_i32_0 = arith.constant 0 : i32
    %c0_i32_1 = arith.constant 0 : i32
    %c0_i32_2 = arith.constant 0 : i32
    return %c0_i32, %c0_i32_0, %c0_i32_1 : i32, i32, i32
  }
  func.func @transform_2(%arg0: i32) -> (i32, i32, i32) {
    %c0_i32 = arith.constant 0 : i32
    %c0_i32_0 = arith.constant 0 : i32
    %c0_i32_1 = arith.constant 0 : i32
    %c0_i32_2 = arith.constant 0 : i32
    return %c0_i32, %c0_i32_0, %c0_i32_1 : i32, i32, i32
  }
  func.func @transform_3(%arg0: i32) -> (i32, i32) {
    %c0_i32 = arith.constant 0 : i32
    %c0_i32_0 = arith.constant 0 : i32
    %c0_i32_1 = arith.constant 0 : i32
    return %c0_i32, %c0_i32_0 : i32, i32
  }
  func.func @transform_4(%arg0: i32) -> (i32, i32) {
    %c0_i32 = arith.constant 0 : i32
    %c0_i32_0 = arith.constant 0 : i32
    %c0_i32_1 = arith.constant 0 : i32
    return %c0_i32, %c0_i32_0 : i32, i32
  }
  func.func @transform_5(%arg0: i32) -> (i32, i32) {
    %c0_i32 = arith.constant 0 : i32
    %c0_i32_0 = arith.constant 0 : i32
    return %arg0, %c0_i32 : i32, i32
  }
  func.func @transform_6(%arg0: i32) -> (i32, i32) {
    %c0_i32 = arith.constant 0 : i32
    %c0_i32_0 = arith.constant 0 : i32
    return %arg0, %c0_i32 : i32, i32
  }
}

</mosaic_0001>

<bundles_post_ra>
// kernel: tpu_custom_call.1
= control target key start
LH: loop header
LB: loop body
LE: loop exit
PB: predicated region body
PF: predicated region fallthrough
CT: control target
= control target key end

     0   :  { %11 = vsyncpa [#allocation3], 0  ;;  %s594_s0 = inlined_call_operand.vmem [shape: f32[8,16], index: 0, kind: input, shape index: {}]   ;;  %s595_s1 = inlined_call_operand.hbm [shape: f32[2,32,32], index: 1, kind: input, shape index: {}]   ;;  %s596_s2 = inlined_call_operand.vmem [shape: f32[2,1,32], index: 2, kind: input, shape index: {}]   ;;  %s597_s3 = inlined_call_operand.vmem [shape: f32[32,6], index: 3, kind: input, shape index: {}]   ;;  %s598_s4 = inlined_call_operand.vmem [shape: f32[1,6], index: 4, kind: input, shape index: {}]   ;;  %s599_s5 = inlined_call_operand.vmem [shape: f32[8,3], index: 5, kind: input, shape index: {}]   ;;  %s600_s6 = inlined_call_operand.hbm [shape: f32[8,8], index: 6, kind: output, shape index: {}]  }
   0x1   :  { %12 = vsyncpa [#allocation4], 0  ;;  %s508_s21 = smov [#allocation2]  }
   0x2   :  { %s20_s22 = sshll.u32 %s508_s21, 4  ;;  %s21_s22 = int_to_ptr.vmem [resolvable:$true] %s20_s22 }
   0x3   :  { %s472_s23 = scalar_lea.vmem %s21_s22, 1024  ;;  %p477_p1 = scmp.lt.s32.totalorder %s21_s22, %s21_s22 }
   0x4   :  { %p473_p0 = scmp.ne.s32.totalorder %s21_s22, %s472_s23  ;;  %p478_p2 = scmp.lt.s32.totalorder %s472_s23, %s472_s23 }
   0x6   :  { %p479_p3 = por %p478_p2, %p477_p1 }
   0x8   :  { %p480_p4 = pnand %p479_p3, %p473_p0 }
   0xa   :  { %483 = shalt.err (!%p480_p4)
}
   0xb   :  { %s509_s24 = smov 128   ;;  %s510_s25 = smov 8  }
   0xc   :  { %26 = dma.hbm_to_vmem [thread:$0]  %s595_s1, 1024, %s21_s22, [#allocation3], %s509_s24, %s509_s24, %s510_s25  }
   0xd   :  { %504 = dma.done.wait [#allocation3], 1024  }
   0xe   :  { %505 = vsyncadd [#allocation3], 4294966272  ;;  %v511_v0 = vmov 0.0   ;;  %vm512_vm0 = vmmov 0   ;;  %v40_v1 = vld [vmem:[#allocation2 + $0x8] sm:$0xff]  ;;  %v39_v2 = vld [vmem:[#allocation2] sm:$0xff]  ;;  %v345_v38 = vlaneseq }
   0xf   :  { %413 = vmatprep.subr.mxu0 %v511_v0  ;;  %417 = vmatprep.mubr.msk.f32.mxu0 %vm512_vm0, %v511_v0  ;;  %v38_v3 = vld [vmem:[%s594_s0] sm:$0xff]  ;;  %vm48_vm1 = vcmask 130048   ;;  %v127_v4 = vld [vmem:[#allocation2 + $0x38] sm:$0xff]  ;;  %v126_v5 = vld [vmem:[#allocation2 + $0x30] sm:$0xff]  ;;  %vm136_vm2 = vcmask 261120   ;;  %s513_s16 = smov 3  }
  0x10   :  { %420 = vmatprep.subr.mxu1 %v511_v0  ;;  %428 = vmatprep.mubr.msk.f32.mxu1 %vm512_vm0, %v511_v0  ;;  %v125_v6 = vld [vmem:[#allocation2 + $0x28] sm:$0xff]  ;;  %v124_v7 = vld [vmem:[#allocation2 + $0x20] sm:$0xff]  ;;  %v214_v8 = vld [vmem:[%s597_s3 + $0x18] sm:$0xff]  ;;  %v515_v33 = vmov 0   ;;  %v346_v41 = vand.u32 127, %v345_v38  ;;  %v516_v46 = vmov 1  }
  0x11   :  { %414 = vmatpush3.msra.mxu0 %v40_v1  ;;  %421 = vmatpush3.msra.mxu1 %v127_v4  ;;  %v392_v9 = vld [vmem:[%s596_s2] ss:$0 sm:$0xff]  ;;  %v213_v14 = vld [vmem:[%s597_s3 + $0x10] sm:$0xff]  ;;  %v212_v15 = vld [vmem:[%s597_s3 + $0x8] sm:$0xff]  ;;  %v517_v49 = vmov 2   ;;  %vm341_vm6 = vcmask 23552  }
  0x12   :  { %415 = vmatprep.subr.mxu0 %v511_v0  ;;  %422 = vmatprep.subr.mxu1 %v511_v0  ;;  %v211_v16 = vld [vmem:[%s597_s3] sm:$0xff]  ;;  %s514_s3 = smov 125   ;;  %vm347_vm3 = vcmp.eq.s32.totalorder %v346_v41, 0  ;;  %vm352_vm7 = vcmp.eq.s32.totalorder %v346_v41, 3  ;;  %vm361_vm8 = vcmp.eq.s32.totalorder %v346_v41, 1  ;;  %vm368_vm9 = vcmp.eq.s32.totalorder %v346_v41, 2 }
  0x13   :  { %416 = vmatpush3.msra.mxu0 %v39_v2  ;;  %423 = vmatpush3.msra.mxu1 %v126_v5  ;;  %v299_v17 = vld [vmem:[%s599_s5] sm:$0xff]  ;;  %vm375_vm10 = vcmask 64512  }
  0x14   :  { %418 = vmatmul.mubr.msk.f32.vlgmr.msra.gmra.mxu0 %vm48_vm1, %v38_v3  ;;  %431 = vmatprep.subr.mxu0 %v511_v0  ;;  %v395_v18 = vld [vmem:[%s596_s2 + $0x1] ss:$0 sm:$0xff]  ;;  %v397_v23 = vld [vmem:[%s598_s4] ss:$0 sm:$0xff]  ;;  %v310_v51 = vmul.f32 -0.5, %v299_v17  ;;  %s518_s2 = smov [#allocation5]  }
  0x15   :  { %439 = vmatprep.mubr.msk.f32.mxu0 %vm512_vm0, %v511_v0  ;;  %424 = vmatprep.subr.mxu1 %v511_v0  ;;  %s383_s4 = sshll.u32 %s518_s2, 4  ;;  %s384_s4 = int_to_ptr.vmem [resolvable:$true] %s383_s4 }
  0x16   :  { %425 = vmatpush3.msra.mxu1 %v125_v6  ;;  %432 = vmatpush3.msra.mxu0 %v214_v8  ;;  %v311_v55 = vmul.f32 %v310_v51, %v299_v17  ;;  %s484_s5 = scalar_lea.vmem %s384_s4, 128  ;;  %p489_p6 = scmp.lt.s32.totalorder %s384_s4, %s384_s4 }
  0x17   :  { %426 = vmatprep.subr.mxu1 %v511_v0  ;;  %433 = vmatprep.subr.mxu0 %v511_v0  ;;  %p485_p5 = scmp.ne.s32.totalorder %s384_s4, %s484_s5  ;;  %p490_p7 = scmp.lt.s32.totalorder %s484_s5, %s484_s5 }
  0x18   :  { %427 = vmatpush3.msra.mxu1 %v124_v7  ;;  %434 = vmatpush3.msra.mxu0 %v213_v14 }
  0x19   :  { %435 = vmatprep.subr.mxu0 %v511_v0  ;;  %301 = vrot.lane.b32.xlu0 %v299_v17, %s513_s16  ;;  %p491_p8 = por %p490_p7, %p489_p6 }
  0x1a   :  { %436 = vmatpush3.msra.mxu0 %v212_v15  ;;  %453 = vset.pattern.permute.xlu0 %v515_v33 }
  0x1b   :  { %437 = vmatprep.subr.mxu0 %v511_v0  ;;  %p492_p9 = pnand %p491_p8, %p485_p5 }
  0x1c   :  { %438 = vmatpush3.msra.mxu0 %v211_v16 }
  0x8b   :  { %v302_v30 = vpop.permute.xlu0 %301 }
  0xd4   :  { %v118_v10 = vpop.f32.mrf.mxu0 }
  0xd5   :  { %v119_v11 = vadd.f32 %v392_v9, %v118_v10 }
  0xd6   :  { %v419_v12 = vpop.f32.mrf.mxu0 }
  0xd7   :  { %v122_v13 = vmax.f32 %v119_v11, 0.0 }
  0xd9   :  { %429 = vmatmul.mubr.msk.f32.vlgmr.msra.gmra.mxu1 %vm136_vm2, %v122_v13 }
 0x199   :  { %v206_v19 = vpop.f32.mrf.mxu1 }
 0x19a   :  { %v207_v20 = vadd.f32 %v395_v18, %v206_v19 }
 0x19b   :  { %v430_v21 = vpop.f32.mrf.mxu1 }
 0x19c   :  { %v210_v22 = vmax.f32 %v207_v20, 0.0 }
 0x19e   :  { %440 = vmatmul.mubr.msk.f32.vlgmr.msra.gmra.mxu0 %vm136_vm2, %v210_v22 }
 0x25e   :  { %v291_v24 = vpop.f32.mrf.mxu0 }
 0x25f   :  { %v292_v25 = vadd.f32 %v397_v23, %v291_v24 }
 0x260   :  { %v441_v26 = vpop.f32.mrf.mxu0 }
 0x261   :  { %v295_v27 = vmax.f32 %v292_v25, -20.0 }
 0x263   :  { %v296_v28 = vmin.f32 %v295_v27, 2.0 }
 0x265   :  { %313 = vrot.lane.b32.xlu1 %v296_v28, %s514_s3  ;;  %v297_v29 = vmul.f32 1.442695, %v296_v28 }
 0x267   :  { %456 = vpow2.f32 %v297_v29 }
 0x274   :  { %v457_v31 = vpop.eup %456 }
 0x275   :  { %v304_v32 = vmul.f32 %v457_v31, %v302_v30 }
 0x277   :  { %306 = vrot.lane.b32.xlu0 %v304_v32, %s514_s3 }
 0x2d7   :  { %v314_v58 = vpop.permute.xlu1 %313 }
 0x2d8   :  { %v316_v62 = vsub.f32 %v311_v55, %v314_v58 }
 0x2da   :  { %v399_v2 = vadd.f32 -0.9189385, %v316_v62 }
 0x2e9   :  { %v307_v34 = vpop.permute.xlu0 %306 }
 0x2ea   :  { %v309_v35 = vadd.f32 %v307_v34, %v292_v25 }
 0x2ec   :  { %v319_v36 = vmul.f32 -2.0, %v309_v35  ;;  %458 = vtanh.f32 %v309_v35  ;;  %v348_v42 = vmax.f32 %v309_v35, 0.0  ;;  %v318_v63 = vsub.f32 0.6931472, %v309_v35 }
 0x2ee   :  { %v323_v37 = vand.u32 2147483647, %v319_v36  ;;  %v349_v43 = vmin.f32 %v348_v42, 6.0  ;;  %v320_v59 = vmax.f32 %v319_v36, 0.0  ;;  %vm321_vm5 = vcmp.ne.f32.partialorder %v319_v36, %v319_v36 }
 0x2f0   :  { %v324_v39 = vsub.f32 0.0, %v323_v37 }
 0x2f2   :  { %v325_v40 = vmul.f32 1.442695, %v324_v39 }
 0x2f4   :  { %460 = vpow2.f32 %v325_v40 }
 0x2f9   :  { %v459_v44 = vpop.eup %458 }
 0x2fa   :  { %v351_v45 = vsel %vm347_vm3, %v349_v43, %v459_v44 }
 0x2fb   :  { %356 = vperm.xlu0 %453, %v351_v45  }
 0x2ff   :  { %454 = vset.pattern.permute.xlu0 %v516_v46 }
 0x300   :  { %363 = vperm.xlu0 %454, %v351_v45  }
 0x301   :  { %v461_v47 = vpop.eup %460 }
 0x302   :  { %v327_v48 = vadd.f32 1.0, %v461_v47  ;;  %v330_v50 = vmul.f32 -0.5, %v461_v47  ;;  %v333_v53 = vand.u32 2147483647, %v461_v47 }
 0x304   :  { %455 = vset.pattern.permute.xlu0 %v517_v49  ;;  %462 = vlog2.f32 %v327_v48  ;;  %v331_v52 = vadd.f32 1.0, %v330_v50  ;;  %vm334_vm4 = vcmp.lt.f32.partialorder %v333_v53, 0.0004427343 }
 0x305   :  { %370 = vperm.xlu0 %455, %v351_v45  }
 0x306   :  { %v332_v57 = vmul.f32 %v461_v47, %v331_v52 }
 0x311   :  { %v463_v54 = vpop.eup %462 }
 0x312   :  { %v329_v56 = vmul.f32 0.6931472, %v463_v54 }
 0x314   :  { %v335_v60 = vsel %vm334_vm4, %v332_v57, %v329_v56 }
 0x315   :  { %v336_v61 = vadd.f32 %v335_v60, %v320_v59 }
 0x317   :  { %v337_v0 = vsel %vm321_vm5, %v319_v36, %v336_v61 }
 0x318   :  { %v338_v1 = vsub.f32 %v318_v63, %v337_v0 }
 0x31a   :  { %v339_v3 = vmul.f32 2.0, %v338_v1 }
 0x31c   :  { %v340_v4 = vsub.f32 %v399_v2, %v339_v3 }
 0x31e   :  { %v342_v5 = vsel %vm341_vm6, %v340_v4, 0.0 }
 0x31f   :  { %343 = vadd.xlane.f32.xlu1 %v342_v5 }
 0x376   :  { %v357_v6 = vpop.permute.xlu0 %356 }
 0x377   :  { %v359_v9 = vsel %vm347_vm3, %v357_v6, 0.0 }
 0x37b   :  { %v364_v7 = vpop.permute.xlu0 %363 }
 0x37c   :  { %v366_v13 = vsel %vm361_vm8, %v364_v7, 0.0 }
 0x380   :  { %v371_v11 = vpop.permute.xlu0 %370 }
 0x381   :  { %v373_v15 = vsel %vm368_vm9, %v371_v11, 0.0 }
 0x3a8   :  { %v344_v8 = vpop.xlane.xlu1 %343 }
 0x3a9   :  { %v353_v10 = vsel %vm352_vm7, %v344_v8, 0.0 }
 0x3aa   :  { %v360_v12 = vadd.f32 %v359_v9, %v353_v10 }
 0x3ac   :  { %v367_v14 = vadd.f32 %v366_v13, %v360_v12 }
 0x3ae   :  { %v374_v16 = vadd.f32 %v373_v15, %v367_v14 }
 0x3b0   :  { %376 = vst.msk [vmem:[#allocation5] sm:$0xff] %vm375_vm10, %v374_v16 }
 0x3b1   :  { %495 = shalt.err (!%p492_p9)
}
 0x3b2   :  { %386 = dma.vmem_to_hbm [thread:$0]  %s384_s4, 128, %s600_s6, [#allocation4]  }
 0x3b3   :  { %506 = dma.done.wait [#allocation4], 128  }
 0x3b4   :  { %507 = vsyncadd [#allocation4], 4294967168 }
 0x3b5   :  { %390 = vsyncpa [#allocation3], 1 }
 0x3b6   :  { %391 = vsyncpa [#allocation4], 1 }

</bundles_post_ra>
